<compile_context>
chip_gen: v7x
topology: tpu7x:2x2x1
jax: 0.10.0
libtpu: 0.0.40
codegen_flags: <defaults>
</compile_context>

<pallas_src>
import functools

import jax
import jax.numpy as jnp
from jax import lax
from jax.experimental import pallas as pl
from jax.experimental.pallas import tpu as pltpu


_LANE = 128        # TPU vreg lane width
_NEG_INF = -1e30   # finite mask value; exp(-1e30 - m) underflows to exactly 0 in f32


def fuse_head_weights(wk, wq, wv, *, use_bf16=False):
    """Fuse + lane-pad the three projection weights ONCE (outside the forward path).

    Each (C, hs) weight is zero-padded along its output dim to a multiple of 128
    lanes, then [k | q | v] are concatenated -> (C, 3*lane).  Returns (w, lane).
    Set use_bf16=True to pre-cast the (re-used) weight to bf16 MXU operands
    (valid on v5e/v6e/v7x; accumulation and softmax stay f32 in the kernel).
    """
    C, hs = wk.shape
    assert wq.shape == (C, hs) and wv.shape == (C, hs)
    lane = pl.cdiv(hs, _LANE) * _LANE
    pad = lane - hs

    def _pad(w):
        return jnp.pad(w, ((0, 0), (0, pad))) if pad else w

    # NOTE: slice order in the kernel (k, q, v) must match this concatenation order.
    w = jnp.concatenate([_pad(wk), _pad(wq), _pad(wv)], axis=1)   # (C, 3*lane)
    if use_bf16:
        w = w.astype(jnp.bfloat16)
    return w, lane


def _head_kernel(x_ref, w_ref, o_ref, *, bb, seq, hs, lane, compute_dtype):
    # x_ref: (bb*seq, C) — already flattened by the wrapper (no in-kernel merge).
    x2 = x_ref[...].astype(compute_dtype)
    w = w_ref[...]                                    # (C, 3*lane), pre-cast in wrapper

    # Fused QKV projection: one (bb*seq, C) @ (C, 3*lane) MXU matmul, f32 accumulate.
    qkv = jnp.dot(x2, w, preferred_element_type=jnp.float32)      # (bb*seq, 3*lane)
    qkv = qkv.reshape(bb, seq, 3 * lane)              # sublane split only (cheap)

    # 128-lane-aligned slices (free). Order matches fuse_head_weights: k, q, v.
    k = qkv[..., 0 * lane:1 * lane].astype(compute_dtype)
    q = qkv[..., 1 * lane:2 * lane].astype(compute_dtype)
    v = qkv[..., 2 * lane:3 * lane].astype(compute_dtype)

    # Scaled causal scores; contraction over the padded 128-wide head dim
    # (zero lanes contribute nothing). Scale uses the TRUE head size.
    scale = 1.0 / (hs ** 0.5)
    scores = jnp.einsum("btd,bsd->bts", q, k,
                        preferred_element_type=jnp.float32) * scale   # (bb, T, T) f32

    # Single 2D (T, T) causal mask, broadcast over the batch block.
    row = lax.broadcasted_iota(jnp.int32, (seq, seq), 0)
    col = lax.broadcasted_iota(jnp.int32, (seq, seq), 1)
    scores = jnp.where((col <= row)[None, :, :], scores, _NEG_INF)

    # Row-wise softmax in f32; reciprocal on the EUP (off the VALU critical path).
    m = jnp.max(scores, axis=-1, keepdims=True)
    p = jnp.exp(scores - m)
    denom = jnp.sum(p, axis=-1, keepdims=True)
    attn = p * pl.reciprocal(denom, approx=True)

    # attn @ V ; output last dim is the padded 128 lanes -> unmasked lane-dense store.
    out = jnp.einsum("bts,bsd->btd", attn.astype(compute_dtype), v,
                     preferred_element_type=jnp.float32)              # (bb, T, lane)
    o_ref[...] = out.astype(o_ref.dtype)


def _pick_batch_block(B, T, *, target_rows=1024, num_cores=2):
    """Batch elements per grid step.

    Aim for ~1024 projection rows per step (amortizes the ~0.35us/step overhead)
    but keep at least `num_cores` grid steps when B allows, so v7x's two
    TensorCores both get work.  No divisor-of-B requirement: the wrapper pads
    the batch to a whole number of blocks.
    """
    bb = max(1, min(B, max(1, target_rows // max(T, 1))))
    if B >= num_cores and pl.cdiv(B, bb) < num_cores:
        bb = pl.cdiv(B, num_cores)
    return bb


def head_forward(x, w_qkv, head_size, lane):
    """Single-head causal self-attention forward (eval path).

    x:      (B, T, C) activations.
    w_qkv:  (C, 3*lane) fused + lane-padded weights from `fuse_head_weights`
            (fuse once at init; do NOT rebuild it every forward call).
    Returns (B, T, head_size) in x.dtype.
    """
    B, T, C = x.shape
    assert w_qkv.shape == (C, 3 * lane)
    compute_dtype = w_qkv.dtype            # bf16 weights => bf16 MXU operands

    bb = _pick_batch_block(B, T)
    nb = pl.cdiv(B, bb)
    Bp = nb * bb

    # Lane/sublane-clean 2D input slab; pad the batch to a whole number of blocks.
    x2 = x.reshape(B * T, C)
    if Bp != B:
        x2 = jnp.pad(x2, ((0, (Bp - B) * T), (0, 0)))

    kernel = functools.partial(_head_kernel, bb=bb, seq=T, hs=head_size,
                               lane=lane, compute_dtype=compute_dtype)

    out = pl.pallas_call(
        kernel,
        out_shape=jax.ShapeDtypeStruct((Bp, T, lane), x.dtype),
        grid_spec=pltpu.PrefetchScalarGridSpec(
            num_scalar_prefetch=0,
            grid=(nb,),
            in_specs=[
                pl.BlockSpec((bb * T, C), lambda b: (b, 0)),       # x rows block
                pl.BlockSpec((C, 3 * lane), lambda b: (0, 0)),     # fused Wqkv (resident)
            ],
            out_specs=pl.BlockSpec((bb, T, lane), lambda b: (b, 0, 0)),
        ),
        compiler_params=pltpu.CompilerParams(
            dimension_semantics=("parallel",)),
    )(x2, w_qkv)

    # Drop batch padding and the zero head-dim padding.
    return out[:B, :, :head_size]


def head_reference(x, wk, wq, wv):
    """Plain-JAX reference mirroring the PyTorch forward (eval path, no dropout)."""
    hs = wk.shape[1]
    k = x @ wk
    q = x @ wq
    v = x @ wv
    scores = jnp.einsum("btd,bsd->bts", q, k) / (hs ** 0.5)
    T = x.shape[1]
    mask = jnp.tril(jnp.ones((T, T), dtype=bool))
    scores = jnp.where(mask[None], scores, -jnp.inf)
    attn = jax.nn.softmax(scores, axis=-1)
    return attn @ v


if __name__ == "__main__":
    # Shapes consistent with the module: B=2, T=8 (== block_size), C=n_emb=32, head_size=16.
    B, T, C, HS = 2, 8, 32, 16

    key = jax.random.PRNGKey(0)
    kx, kk, kq, kv = jax.random.split(key, 4)
    x = jax.random.normal(kx, (B, T, C), dtype=jnp.float32)
    # nn.Linear default init scale ~ 1/sqrt(fan_in).
    wk = jax.random.normal(kk, (C, HS), dtype=jnp.float32) / (C ** 0.5)
    wq = jax.random.normal(kq, (C, HS), dtype=jnp.float32) / (C ** 0.5)
    wv = jax.random.normal(kv, (C, HS), dtype=jnp.float32) / (C ** 0.5)

    ref = head_reference(x, wk, wq, wv)

    # f32 path (module semantics; tolerance covers the EUP approximate reciprocal).
    w_f32, lane = fuse_head_weights(wk, wq, wv, use_bf16=False)   # fused ONCE, at init
    out = head_forward(x, w_f32, HS, lane)
    out = jax.block_until_ready(out)
    assert out.shape == (B, T, HS)
    assert jnp.allclose(out, ref, atol=1e-2, rtol=1e-2), "f32 Pallas output mismatch vs reference"

    # bf16 MXU operand path (valid on v5e/v6e/v7x); looser tolerance for bf16 rounding.
    w_bf16, lane = fuse_head_weights(wk, wq, wv, use_bf16=True)
    out_bf16 = head_forward(x, w_bf16, HS, lane)
    out_bf16 = jax.block_until_ready(out_bf16)
    assert out_bf16.shape == (B, T, HS)
    assert jnp.allclose(out_bf16, ref, atol=1e-1, rtol=1e-1), "bf16 Pallas output mismatch vs reference"

    print("KERNEL_OK")
</pallas_src>

<mosaic_0001>
module attributes {stable_mosaic.version = 11 : i64} {
  func.func @_head_kernel(%arg0: i32, %arg1: memref<8x32xf32, #tpu.memory_space<vmem>>, %arg2: memref<32x384xf32, #tpu.memory_space<vmem>>, %arg3: memref<1x8x128xf32, #tpu.memory_space<vmem>>) attributes {dimension_semantics = [#tpu.dimension_semantics<parallel>], iteration_bounds = array<i64: 2>, scalar_prefetch = 0 : i64, scratch_operands = 0 : i64, tpu.core_type = #tpu.core_type<tc>, window_params = [{transform_indices = @transform_0, window_bounds = array<i64: 8, 32>}, {pipeline_mode = #tpu.pipeline_mode<synchronous>, transform_indices = @transform_1, window_bounds = array<i64: 32, 384>}, {transform_indices = @transform_2, window_bounds = array<i64: 1, 8, 128>}]} {
    %c0 = arith.constant 0 : index
    %c0_0 = arith.constant 0 : index
    %0 = vector.load %arg1[%c0, %c0_0] : memref<8x32xf32, #tpu.memory_space<vmem>>, vector<8x32xf32>
    %c0_1 = arith.constant 0 : index
    %c0_2 = arith.constant 0 : index
    %1 = vector.load %arg2[%c0_1, %c0_2] : memref<32x384xf32, #tpu.memory_space<vmem>>, vector<32x384xf32>
    %cst = arith.constant dense<0.000000e+00> : vector<8x384xf32>
    %2 = tpu.matmul %0, %1, %cst {dimension_numbers = #tpu.dot_dimension_numbers<[1], [0], [0], [1], [0, 0, 1, 1], [], []>} : vector<8x32xf32>, vector<32x384xf32>, vector<8x384xf32> -> vector<8x384xf32>
    %3 = vector.shape_cast %2 : vector<8x384xf32> to vector<1x8x384xf32>
    %4 = vector.extract_strided_slice %3 {offsets = [0, 0, 0], sizes = [1, 8, 128], strides = [1, 1, 1]} : vector<1x8x384xf32> to vector<1x8x128xf32>
    %5 = vector.extract_strided_slice %3 {offsets = [0, 0, 128], sizes = [1, 8, 128], strides = [1, 1, 1]} : vector<1x8x384xf32> to vector<1x8x128xf32>
    %6 = vector.extract_strided_slice %3 {offsets = [0, 0, 256], sizes = [1, 8, 128], strides = [1, 1, 1]} : vector<1x8x384xf32> to vector<1x8x128xf32>
    "tpu.trace_start"() <{level = 10 : i32, message = "btd,bsd->bts"}> : () -> ()
    %cst_3 = arith.constant dense<0.000000e+00> : vector<1x8x8xf32>
    %7 = tpu.matmul %5, %4, %cst_3 {dimension_numbers = #tpu.dot_dimension_numbers<[2], [2], [1], [1], [0, 0, 0, 1, 1, 1], [0], [0]>} : vector<1x8x128xf32>, vector<1x8x128xf32>, vector<1x8x8xf32> -> vector<1x8x8xf32>
    "tpu.trace_stop"() : () -> ()
    %cst_4 = arith.constant 2.500000e-01 : f32
    %8 = vector.broadcast %cst_4 : f32 to vector<1x8x8xf32>
    %9 = arith.mulf %7, %8 : vector<1x8x8xf32>
    %10 = tpu.iota {dimensions = array<i32: 0>} : vector<8x8xi32>
    %11 = tpu.iota {dimensions = array<i32: 1>} : vector<8x8xi32>
    %12 = arith.cmpi sle, %11, %10 : vector<8x8xi32>
    %13 = vector.shape_cast %12 : vector<8x8xi1> to vector<1x8x8xi1>
    %cst_5 = arith.constant -1.000000e+30 : f32
    %14 = vector.broadcast %cst_5 : f32 to vector<1x8x8xf32>
    %15 = arith.select %13, %9, %14 : vector<1x8x8xi1>, vector<1x8x8xf32>
    %cst_6 = arith.constant dense<0xFF800000> : vector<1x8xf32>
    %16 = vector.multi_reduction <maximumf>, %15, %cst_6 [2] : vector<1x8x8xf32> to vector<1x8xf32>
    %17 = vector.shape_cast %16 : vector<1x8xf32> to vector<1x8x1xf32>
    %18 = vector.broadcast %17 : vector<1x8x1xf32> to vector<1x8x8xf32>
    %19 = arith.subf %15, %18 : vector<1x8x8xf32>
    %20 = math.exp %19 : vector<1x8x8xf32>
    %cst_7 = arith.constant dense<0.000000e+00> : vector<1x8xf32>
    %21 = vector.multi_reduction <add>, %20, %cst_7 [2] : vector<1x8x8xf32> to vector<1x8xf32>
    %22 = vector.shape_cast %21 : vector<1x8xf32> to vector<1x8x1xf32>
    %23 = tpu.reciprocal %22 {approx = true} : vector<1x8x1xf32> -> vector<1x8x1xf32>
    %24 = vector.broadcast %23 : vector<1x8x1xf32> to vector<1x8x8xf32>
    %25 = arith.mulf %20, %24 : vector<1x8x8xf32>
    "tpu.trace_start"() <{level = 10 : i32, message = "bts,bsd->btd"}> : () -> ()
    %cst_8 = arith.constant dense<0.000000e+00> : vector<1x8x128xf32>
    %26 = tpu.matmul %25, %6, %cst_8 {dimension_numbers = #tpu.dot_dimension_numbers<[2], [1], [1], [2], [0, 0, 0, 1, 1, 2], [0], [0]>} : vector<1x8x8xf32>, vector<1x8x128xf32>, vector<1x8x128xf32> -> vector<1x8x128xf32>
    "tpu.trace_stop"() : () -> ()
    %c0_9 = arith.constant 0 : index
    %c0_10 = arith.constant 0 : index
    %c0_11 = arith.constant 0 : index
    %27 = vector.load %arg3[%c0_9, %c0_10, %c0_11] : memref<1x8x128xf32, #tpu.memory_space<vmem>>, vector<1x8x128xf32>
    tpu.vector_store %arg3[%c0_9, %c0_10, %c0_11], %26 {strides = array<i32>} : memref<1x8x128xf32, #tpu.memory_space<vmem>>, vector<1x8x128xf32>,
    return
  }
  func.func @transform_0(%arg0: i32) -> (i32, i32) {
    %c0_i32 = arith.constant 0 : i32
    %c0_i32_0 = arith.constant 0 : i32
    return %arg0, %c0_i32 : i32, i32
  }
  func.func @transform_1(%arg0: i32) -> (i32, i32) {
    %c0_i32 = arith.constant 0 : i32
    %c0_i32_0 = arith.constant 0 : i32
    %c0_i32_1 = arith.constant 0 : i32
    return %c0_i32, %c0_i32_0 : i32, i32
  }
  func.func @transform_2(%arg0: i32) -> (i32, i32, i32) {
    %c0_i32 = arith.constant 0 : i32
    %c0_i32_0 = arith.constant 0 : i32
    %c0_i32_1 = arith.constant 0 : i32
    return %arg0, %c0_i32, %c0_i32_0 : i32, i32, i32
  }
}

</mosaic_0001>

<bundles_post_ra>
// kernel: tpu_custom_call.1
= control target key start
LH: loop header
LB: loop body
LE: loop exit
PB: predicated region body
PF: predicated region fallthrough
CT: control target
= control target key end

     0   :  { %7 = vsyncpa [#allocation3], 0  ;;  %s1077_s0 = inlined_call_operand.hbm [shape: f32[16,32], index: 0, kind: input, shape index: {}]   ;;  %s1078_s1 = inlined_call_operand.hbm [shape: f32[32,384], index: 1, kind: input, shape index: {}]   ;;  %s1079_s2 = inlined_call_operand.hbm [shape: f32[2,8,128], index: 2, kind: output, shape index: {}]  }
   0x1   :  { %9 = vsyncpa [#allocation3 + $0x1], 0 }
   0x2   :  { %10 = vsyncpa [#allocation6], 0 }
   0x3   :  { %11 = vsyncpa [#allocation4], 0 }
   0x4   :  { %13 = vsyncpa [#allocation4 + $0x1], 0  ;;  %s869_s9 = smov 0   ;;  %s871_s10 = smov 0  }
   0x5   :  { %s873_s11 = smov 0   ;;  %s875_s12 = smov 0  }
   0x6 LB: > { %s890_s13 = sadd.s32 4294967295, %s844_s12   ;;  %s589_s14 = sadd.s32 4294967294, %s844_s12   ;;  %s844_s12 = sphi %s875_s12, %s1099_s12   ;;  %s840_s11 = sphi %s873_s11, %s1098_s11   ;;  %s836_s10 = sphi %s871_s10, %s1097_s10   ;;  %s832_s9 = sphi %s869_s9, %s1096_s9  }
   0x7   : > { %p39_p0 = scmp.ne.s32.totalorder %s836_s10, %s832_s9  ;;  %p1080_p1 = scmp.eq.s32.totalorder %s890_s13, 0 }
   0x8   : > { %p90_p3 = scmp.eq.s32.totalorder %s589_s14, 1  ;;  %p590_p5 = scmp.ge.s32.totalorder %s844_s12, 1 }
   0x9   : > { %p899_p4 = por %p1080_p1, %p39_p0  ;;  %p97_p7 = scmp.lt.s32.totalorder %s844_s12, 3 }
   0xa   : > { %p904_p6 = por %p90_p3, %p39_p0  ;;  %s846_s18 = smov [#allocation5]  }
   0xb   : > { %s1083_s15 = scalar_select %p899_p4, 1, 0 }
   0xc   : > { %s1084_s16 = scalar_select %p904_p6, 1, 0 }
   0xd   : > { %p909_p8 = pnand %p590_p5, %p97_p7  ;;  %s109_s19 = sshll.u32 %s846_s18, 4  ;;  %s913_s19 = int_to_ptr.vmem [resolvable:$true] %s109_s19 }
   0xe   : > { %s925_s21 = sadd.s32 1, %s844_s12   ;;  %s26_s22 = sadd.s32 1, %s840_s11 }
   0xf   : > { %s1085_s17 = scalar_select %p909_p8, 1, 0 }
  0x10   : > { %p658_p9 = pneg %p909_p8  ;;  %s23_s23 = ssub.s32 %s844_s12, %s925_s21 }
  0x11   : > { %s716_s26 = scalar_lea.hbm %s1078_s1, 1536 }
  0x12   : > { %p920_p11 = pnand %p658_p9, %p1080_p1  ;;  %p717_p12 = scmp.ne.s32.totalorder %s1078_s1, %s716_s26 }
  0x13   : > { %p723_p5 = scmp.lt.u32.totalorder %s716_s26, %s1078_s1 }
  0x14   : > { %p718_p13 = pneg %p920_p11 }
  0x16   : > { %p719_p0 = pnand %p718_p13, %p717_p12 }
  0x18   : > { %p720_p3 = pneg %p719_p0 }
  0x1a   : > { %p725_p7 = pnand %p723_p5, %p720_p3 }
  0x1c   : > { %728 = shalt.err (!%p725_p7)
}
  0x1d   : > { %s729_s3 = scalar_lea.vmem %s913_s19, 1536  ;;  %p737_p2 = scmp.lt.s32.totalorder %s913_s19, %s913_s19 }
  0x1e   : > { %p730_p9 = scmp.ne.s32.totalorder %s913_s19, %s729_s3  ;;  %p738_p6 = scmp.lt.s32.totalorder %s729_s3, %s729_s3 }
  0x20   : > { %p732_p10 = pnand %p730_p9, %p718_p13  ;;  %p739_p4 = por %p738_p6, %p737_p2 }
  0x22   : > { %p733_p1 = pneg %p732_p10 }
  0x24   : > { %p740_p8 = pnand %p739_p4, %p733_p1 }
  0x26   : > { %743 = shalt.err (!%p740_p8)
}
  0x27   : > { %s847_s4 = smov 384   ;;  %s848_s5 = smov 24  }
  0x28   : > { %661 = dma.hbm_to_vmem [thread:$0]  (!%p920_p11), %s1078_s1, 1536, %s913_s19, [#allocation6], %s847_s4, %s847_s4, %s848_s5  }
  0x29   : > { %p24_p2 = scmp.eq.s32.totalorder %s23_s23, 0  ;;  %p33_p1 = scmp.ne.s32.totalorder %s840_s11, %s836_s10 }
  0x2a   : > { %p34_p4 = scmp.eq.s32.totalorder %s844_s12, 0  ;;  %p671_p6 = scmp.lt.s32.totalorder %s844_s12, 2 }
  0x2b   : > { %s956_s8 = scalar_select %p24_p2, %s840_s11, %s26_s22  }
  0x2c   : > { %p35_p8 = por %p34_p4, %p33_p1  ;;  %p1087_p10 = scmp.eq.s32.totalorder %s890_s13, 1 }
  0x2d   : > { %s123_s18 = sand.u32 1, %s840_s11   ;;  %s594_s24 = sshll.u32 %s844_s12, 7 }
  0x2e   : > { %p960_p12 = por %p1087_p10, %p33_p1  ;;  %s593_s25 = sshll.u32 %s123_s18, 3 }
  0x2f   : > { %s969_s27 = scalar_lea.hbm %s1077_s0, %s594_s24  ;;  %s127_s19 = scalar_lea.vmem [#allocation2], %s593_s25 }
  0x30   : > { %s134_s22 = sshll.u32 %s127_s19, 4  ;;  %p971_p11 = pnand %p671_p6, %p35_p8  ;;  %s975_s22 = int_to_ptr.vmem [resolvable:$true] %s134_s22 }
  0x31   : > { %s124_s28 = scalar_lea.sflag [#allocation3], %s123_s18  ;;  %s744_s29 = scalar_lea.hbm %s969_s27, 128 }
  0x32   : > { %p745_p13 = scmp.ne.s32.totalorder %s969_s27, %s744_s29  ;;  %p746_p0 = pneg %p971_p11 }
  0x33   : > { %s749_s4 = scalar_lea.hbm %s1077_s0, 256  ;;  %p750_p7 = scmp.lt.u32.totalorder %s969_s27, %s1077_s0 }
  0x34   : > { %p747_p3 = pnand %p746_p0, %p745_p13  ;;  %p751_p9 = scmp.lt.u32.totalorder %s749_s4, %s744_s29 }
  0x35   : > { %p753_p1 = scmp.lt.u32.totalorder %s744_s29, %s969_s27 }
  0x36   : > { %p748_p5 = pneg %p747_p3  ;;  %p752_p2 = por %p751_p9, %p750_p7 }
  0x38   : > { %p754_p4 = por %p753_p1, %p752_p2 }
  0x3a   : > { %p755_p6 = pnand %p754_p4, %p748_p5 }
  0x3c   : > { %758 = shalt.err (!%p755_p6)
}
  0x3d   : > { %s759_s7 = scalar_lea.vmem %s975_s22, 128  ;;  %s849_s18 = smov [#allocation2]  }
  0x3e   : > { %p760_p8 = scmp.ne.s32.totalorder %s975_s22, %s759_s7  ;;  %s764_s24 = sshll.u32 %s849_s18, 4  ;;  %s765_s24 = int_to_ptr.vmem [resolvable:$false] %s764_s24 }
  0x3f   : > { %s766_s25 = scalar_lea.vmem %s765_s24, 256  ;;  %p767_p3 = scmp.lt.s32.totalorder %s975_s22, %s765_s24 }
  0x40   : > { %p762_p10 = pnand %p760_p8, %p746_p0  ;;  %p768_p7 = scmp.lt.s32.totalorder %s766_s25, %s759_s7 }
  0x42   : > { %p763_p13 = pneg %p762_p10  ;;  %p769_p9 = por %p768_p7, %p767_p3 }
  0x44   : > { %p770_p2 = pnand %p769_p9, %p763_p13 }
  0x46   : > { %773 = shalt.err (!%p770_p2)
}
  0x47   : > { %665 = dma.hbm_to_vmem [thread:$0]  (!%p971_p11), %s969_s27, 128, %s975_s22, %s124_s28  }
  0x48   : > { %p1090_p5 = scmp.ne.s32.totalorder %s1085_s17, 0 }
  0x49   : > { %s1005_s20 = sand.u32 (!%p1090_p5), 1, %s836_s10   ;;  %p1091_p0 = scmp.ne.s32.totalorder (!%p1090_p5), %s1083_s15, 0 }
  0x4a   : > { %143 = sbr.rel (%p1090_p5) target bundleno = 1066 (0x42a), region = 28  ;;  %s596_s26 = sshll.u32 (!%p1090_p5), %s1005_s20, 3 }
  0x4b   : > { %s146_s19 = scalar_lea.sflag (!%p1090_p5), [#allocation3], %s1005_s20  ;;  %s149_s29 = scalar_lea.vmem (!%p1090_p5), [#allocation2], %s596_s26 }
  0x51   : > { %819 = dma.done.wait (%p1091_p0), %s146_s19, 128  }
  0x52   : > { %821 = vsyncadd (%p1091_p0), %s146_s19, 4294967168  ;;  %p1092_p11 = scmp.eq.s32.totalorder %s890_s13, 0 }
  0x54   : > { %823 = dma.done.wait (%p1092_p11), [#allocation6], 1536   ;;  %p1093_p1 = pmov %p1092_p11 }
  0x55   : > { %v850_v0 = vmov 0.0   ;;  %v176_v1 = vld [vmem:[#allocation5 + $0x8] sm:$0xff]  ;;  %v179_v2 = vld [vmem:[#allocation5 + $0x20] sm:$0xff]  ;;  %v178_v5 = vld [vmem:[#allocation5 + $0x18] sm:$0xff]  ;;  %vm187_vm0 = vcmask 261120   ;;  %vm851_vm1 = vmmov 0   ;;  %v403_v23 = vlaneseq }
  0x56   : > { %825 = vsyncadd (%p1093_p1), [#allocation6], 4294965760  ;;  %255 = vmatprep.mubr.f32.mxu0 %v850_v0  ;;  %v175_v3 = vld [vmem:[#allocation5] sm:$0xff]  ;;  %v636_v4 = vpack.c.bf16 %v179_v2, %v176_v1  ;;  %v182_v6 = vld [vmem:[#allocation5 + $0x38] sm:$0xff]  ;;  %623 = vmatprep.mubr.msk.f32.mxu1 %vm851_vm1, %v850_v0  ;;  %v852_v19 = vmov 0.0|0.0   ;;  %vm409_vm3 = vcmask 64512  }
  0x57   : > { %v185_v7 = vld [vmem:[#allocation5 + $0x50] sm:$0xff]  ;;  %v638_v8 = vpack.c.bf16 %v178_v5, %v175_v3  ;;  %v184_v11 = vld [vmem:[#allocation5 + $0x48] sm:$0xff]  ;;  %v183_v18 = vld [vmem:[#allocation5 + $0x40] sm:$0xff]  ;;  %644 = vmatprep.subr.bf16.mxu1 %v852_v19  ;;  %v404_v24 = vshrl.u32 %v403_v23, 7  ;;  %v406_v25 = vand.u32 127, %v403_v23  ;;  %s173_s15 = scalar_lea.vmem [#allocation7], %s596_s26 }
  0x58   : > { %v640_v9 = vpack.c.bf16 %v185_v7, %v182_v6  ;;  %v181_v10 = vld [vmem:[#allocation5 + $0x30] sm:$0xff]  ;;  %637 = vmatprep.subr.bf16.mxu0 %v636_v4  ;;  %v180_v17 = vld [vmem:[#allocation5 + $0x28] sm:$0xff]  ;;  %v186_v21 = vld [vmem:[#allocation5 + $0x58] sm:$0xff]  ;;  %s509_s17 = sshll.u32 %s173_s15, 4  ;;  %s603_s27 = sshll.u32 %s890_s13, 7  ;;  %s1030_s17 = int_to_ptr.vmem [resolvable:$true] %s509_s17 }
  0x59   : > { %639 = vmatpush1.bf16.msra.mxu0 %v638_v8  ;;  %v642_v12 = vpack.c.bf16 %v184_v11, %v181_v10  ;;  %v174_v13 = vld [vmem:[%s149_s29] sm:$0xff]  ;;  %v648_v22 = vpack.c.bf16 %v186_v21, %v183_v18  ;;  %vm407_vm2 = vcmp.le.s32.totalorder %v406_v25, %v404_v24  ;;  %s1035_s28 = scalar_lea.hbm %s1079_s2, %s603_s27  ;;  %s496_s30 = scalar_lea.sflag [#allocation4], %s1005_s20 }
  0x5a   : > { %641 = vmatprep.subr.bf16.mxu0 %v640_v9  ;;  %v177_v16 = vld [vmem:[#allocation5 + $0x10] sm:$0xff]  ;;  %s774_s3 = scalar_lea.vmem %s1030_s17, 128  ;;  %s853_s13 = smov [#allocation7]  }
  0x5b   : > { %v645_v20 = vpack.c.bf16 %v180_v17, %v177_v16  ;;  %p775_p4 = scmp.ne.s32.totalorder %s1030_s17, %s774_s3  ;;  %s778_s4 = sshll.u32 %s853_s13, 4  ;;  %s779_s4 = int_to_ptr.vmem [resolvable:$false] %s778_s4 }
  0x5c   : > { %s780_s5 = scalar_lea.vmem %s779_s4, 256  ;;  %p781_p10 = scmp.lt.s32.totalorder %s1030_s17, %s779_s4 }
  0x5d   : > { %643 = vmatpush1.bf16.msra.mxu0 %v642_v12  ;;  %646 = vmatpush3.bf16.msra.mxu1 %v645_v20  ;;  %p776_p6 = pnand %p775_p4, %p960_p12  ;;  %p782_p13 = scmp.lt.s32.totalorder %s780_s5, %s774_s3 }
  0x5e   : > { %626 = vmatprep.subr.mxu0 %v850_v0  ;;  %647 = vmatprep.subr.bf16.mxu1 %v852_v19 }
  0x5f   : > { %p777_p8 = pneg %p776_p6  ;;  %p783_p3 = por %p782_p13, %p781_p10 }
  0x60   : > { %599 = vmatmul.mubr.msk.f32.vlgmr.msra.gmra.mrb[0].mxu0 %vm187_vm0, %v174_v13 }
  0x61   : > { %628 = vmatprep.mubr.msk.f32.mxu0 %vm851_vm1, %v850_v0  ;;  %649 = vmatpush3.bf16.msra.mxu1 %v648_v22  ;;  %p784_p7 = pnand %p783_p3, %p777_p8 }
  0x62   : > { %631 = vmatprep.subr.mxu1 %v850_v0 }
  0x64   : > { %624 = vmatmul.mubr.msk.f32.vlgmr.msra.gmra.mrb[0].mxu1 %vm187_vm0, %v174_v13 }
  0x65   : > { %633 = vmatprep.mubr.msk.f32.mxu1 %vm851_vm1, %v850_v0 }
 0x133   : > { %v257_v14 = vpop.f32.mrb[0].mxu0 }
 0x134   : > { %v259_v15 = vpop.f32.mrb[1].mxu0  ;;  %627 = vmatpush3.xpose.msra.mxu0 %v257_v14 }
 0x137   : > { %629 = vmatmul.mubr.f32.vlgmr.msra.gmra.mrb[2].mxu0 %v259_v15  ;;  %v328_v36 = vpop.f32.mrb[0].mxu1 }
 0x138   : > { %v625_v37 = vpop.f32.mrb[1].mxu1  ;;  %632 = vmatpush3.msra.mxu1 %v328_v36 }
 0x20a   : > { %v398_v26 = vpop.f32.mrb[2].mxu0 }
 0x20b   : > { %v402_v27 = vmul.f32 0.25, %v398_v26  ;;  %v630_v28 = vpop.f32.mrb[3].mxu0 }
 0x20d   : > { %v408_v29 = vsel %vm407_vm2, %v402_v27, -1e+30 }
 0x20e   : > { %v410_v30 = vsel %vm409_vm3, %v408_v29, -inf }
 0x20f   : > { %411 = vmax.xlane.f32.xlu0 %v410_v30 }
 0x29c   : > { %v412_v31 = vpop.xlane.xlu0 %411 }
 0x29d   : > { %v413_v32 = vsub.f32 %v408_v29, %v412_v31 }
 0x29f   : > { %v414_v33 = vmul.f32 1.442695, %v413_v32 }
 0x2a1   : > { %712 = vpow2.f32 %v414_v33 }
 0x2ab   : > { %v713_v34 = vpop.eup %712 }
 0x2ac   : > { %v416_v35 = vsel %vm409_vm3, %v713_v34, 0.0 }
 0x2ad   : > { %417 = vadd.xlane.f32.xlu0 %v416_v35 }
 0x33a   : > { %v418_v38 = vpop.xlane.xlu0 %417 }
 0x33b   : > { %714 = vrcp.f32 %v418_v38 }
 0x345   : > { %v715_v39 = vpop.eup %714 }
 0x346   : > { %v420_v40 = vmul.f32 %v715_v39, %v713_v34 }
 0x348   : > { %634 = vmatmul.mubr.msk.f32.vlgmr.msra.gmra.mrb[2].mxu1 %vm409_vm3, %v420_v40 }
 0x41b   : > { %v490_v41 = vpop.f32.mrb[2].mxu1 }
 0x41c   : > { %494 = vst [vmem:[%s173_s15] sm:$0xff] %v490_v41  ;;  %v635_v42 = vpop.f32.mrb[3].mxu1 }
 0x41d   : > { %787 = shalt.err (!%p784_p7)
}
 0x41e   : > { %s788_s6 = scalar_lea.hbm %s1035_s28, 128  ;;  %s792_s24 = scalar_lea.hbm %s1079_s2, 256 }
 0x41f   : > { %p789_p9 = scmp.ne.s32.totalorder %s1035_s28, %s788_s6  ;;  %p793_p0 = scmp.lt.u32.totalorder %s1035_s28, %s1079_s2 }
 0x420   : > { %p794_p11 = scmp.lt.u32.totalorder %s792_s24, %s788_s6  ;;  %p796_p4 = scmp.lt.u32.totalorder %s788_s6, %s1035_s28 }
 0x421   : > { %p790_p2 = pnand %p789_p9, %p960_p12 }
 0x422   : > { %p795_p1 = por %p794_p11, %p793_p0 }
 0x423   : > { %p791_p5 = pneg %p790_p2 }
 0x424   : > { %p797_p6 = por %p796_p4, %p795_p1 }
 0x426   : > { %p798_p8 = pnand %p797_p6, %p791_p5 }
 0x428   : > { %801 = shalt.err (!%p798_p8)
}
 0x429   : > { %656 = dma.vmem_to_hbm [thread:$0]  (%p960_p12), %s1030_s17, 128, %s1035_s28, %s496_s30  }
 0x42a PF: > { %s521_s26 = sand.u32 1, %s832_s9   ;;  %p1094_p10 = scmp.ne.s32.totalorder %s1084_s16, 0 }
 0x42b   : > { %p1095_p13 = scmp.ge.s32.totalorder %s844_s12, 2  ;;  %s522_s19 = scalar_lea.sflag [#allocation4], %s521_s26 }
 0x42d   : > { %p667_p3 = pnand %p1095_p13, %p1094_p10 }
 0x42f   : > { %827 = dma.done.wait (!%p667_p3), %s522_s19, 128  }
 0x430   : > { %829 = vsyncadd (!%p667_p3), %s522_s19, 4294967168  ;;  %p16_p7 = scmp.ge.s32.totalorder %s925_s21, 4   ;;  %s1096_s9 = smov %s836_s10 }
 0x431   : > { %s1097_s10 = smov %s840_s11  ;;  %s1098_s11 = smov %s956_s8 }
 0x432   : > { %s1099_s12 = smov %s925_s21  ;;  %18 = sbr.rel (!%p16_p7) target bundleno = 6 (0x6), region = 77 }
 0x439   :  { %527 = vsyncpa [#allocation3], 1 }
 0x43a   :  { %529 = vsyncpa [#allocation3 + $0x1], 1 }
 0x43b   :  { %530 = vsyncpa [#allocation6], 1 }
 0x43c   :  { %531 = vsyncpa [#allocation4], 1 }
 0x43d   :  { %533 = vsyncpa [#allocation4 + $0x1], 1 }

</bundles_post_ra>
